<compile_context>
chip_gen: v7x
topology: tpu7x:2x2x1
jax: 0.10.0
libtpu: 0.0.40
codegen_flags: <defaults>
</compile_context>

<pallas_src>
import functools

import jax
import jax.numpy as jnp
from jax import lax
from jax.experimental import pallas as pl
from jax.experimental.pallas import tpu as pltpu

PADDING_IDX = 0
SMOOTHING = 0.0  # smoothing == 0.0 -> plain NLL; kernel implements this case.


def _round_up(x, m):
    return ((x + m - 1) // m) * m


def _xent_kernel(ht_ref, lab_ref, out_ref, *, n_rows, tn):
    """Per-row NLL over one lane-major block of `tn` rows.

    ht_ref : (C, tn)  logits; rows on the 128-lane axis, classes on sublanes.
    lab_ref: (1, tn)  int32 labels (lane-major).
    out_ref: (1, tn)  masked per-row losses (float32), written exactly once.
    """
    x = ht_ref[...].astype(jnp.float32)          # (C, tn) f32 math (v5e has no bf16 VPU/EUP)
    lab = lab_ref[...]                           # (1, tn) int32

    # Numerically stable logsumexp over classes (sublane axis): elementwise
    # VPU max/add across the C/8 vreg rows + one 8-wide sublane reduce.
    m = jnp.max(x, axis=0, keepdims=True)        # (1, tn)
    s = jnp.sum(jnp.exp(x - m), axis=0, keepdims=True)
    lse = jnp.log(s) + m                         # (1, tn)

    # x[labels[i], i] via one-hot select against a class iota.
    # NOTE: out-of-range labels (>= C) pick 0 -> loss == lse; apex would read
    # out of bounds there, so only in-range labels are supported (as before).
    cls = lax.broadcasted_iota(jnp.int32, x.shape, 0)
    picked = jnp.sum(jnp.where(cls == lab, x, 0.0), axis=0, keepdims=True)

    loss = lse - picked                          # (1, tn)

    # Mask: padding rows contribute 0; tail columns past N (partial last
    # block) contribute 0.  The tail block's DMA may bring garbage (possibly
    # inf/NaN after exp/log) for columns >= N -- this is only safe because
    # jnp.where lowers to a select (NaN in the unselected branch does not
    # propagate).  Do NOT refactor into multiply-by-mask or mask-after-sum.
    valid = lab != PADDING_IDX
    if n_rows % tn != 0:
        cols = pl.program_id(0) * tn + lax.broadcasted_iota(jnp.int32, (1, tn), 1)
        valid = valid & (cols < n_rows)

    out_ref[...] = jnp.where(valid, loss, 0.0)


def gcn_uturn_apex(h, labels, *, tn=None):
    """h: [N, C] float, labels: [N] int -> scalar float32 (summed NLL)."""
    n, c = h.shape
    itemsize = jnp.dtype(h.dtype).itemsize

    # Physical VMEM per TensorCore (v5e/v6e: 128 MiB, v7x: 64 MiB).
    try:
        vmem_cap = int(pltpu.get_tpu_info().vmem_capacity_bytes)
    except Exception:
        vmem_cap = 64 << 20  # conservative fallback (v7x per-TC)

    # VMEM bytes per row of a block: double-buffered input column in the HBM
    # dtype + ~4 float32 temporaries (x, x-m, exp, one-hot select) + the tiny
    # lane-major label/output blocks.
    row_bytes = 2 * c * itemsize + 4 * c * 4 + 4 * 4
    # Per-chip tile budget: ~48 MiB worth of working set on v5e/v6e, ~32 MiB
    # on v7x -> ~8 MiB / ~5 MiB of h per buffer for C=32 f32 (HBM-bound tiles).
    budget = min(48 << 20, vmem_cap // 2)

    if tn is None:
        tn = max(128, ((budget // row_bytes) // 128) * 128)
    if tn >= n:
        tn = n                       # single full-extent block (any N allowed)
    nb = pl.cdiv(n, tn)

    # Exact scoped-VMEM accounting (no double hedge), clamped to
    # [32 MiB default, 7/8 of physical] so large tiles compile everywhere.
    needed = row_bytes * tn + (4 << 20)
    vmem_limit = int(min(vmem_cap * 7 // 8, max(needed, 32 << 20)))

    # Lane-dense layout: rows -> lanes, classes -> sublanes.
    h_t = h.T                                            # (C, N)
    labels2d = labels.astype(jnp.int32).reshape(1, n)    # (1, N)

    kernel = functools.partial(_xent_kernel, n_rows=n, tn=tn)

    out = pl.pallas_call(
        kernel,
        out_shape=jax.ShapeDtypeStruct((1, nb * tn), jnp.float32),
        grid_spec=pltpu.PrefetchScalarGridSpec(
            num_scalar_prefetch=0,
            grid=(nb,),
            in_specs=[
                pl.BlockSpec((c, tn), lambda i: (0, i)),   # logits slab
                pl.BlockSpec((1, tn), lambda i: (0, i)),   # labels (lane-major)
            ],
            out_specs=pl.BlockSpec((1, tn), lambda i: (0, i)),
        ),
        compiler_params=pltpu.CompilerParams(
            dimension_semantics=("parallel",),
            vmem_limit_bytes=vmem_limit,
        ),
    )(h_t, labels2d)

    # Tiny lane-dense final reduction (padded tail columns are already 0).
    return jnp.sum(out)


def gcn_uturn_apex_ref(h, labels):
    """Pure-JAX reference of the apex xentropy forward + sum."""
    h = h.astype(jnp.float32)
    lse = jax.nn.logsumexp(h, axis=-1)
    picked = jnp.take_along_axis(h, labels[:, None].astype(jnp.int32), axis=-1)[:, 0]
    loss = jnp.where(labels != PADDING_IDX, lse - picked, 0.0)
    return loss.sum()


if __name__ == "__main__":
    key = jax.random.PRNGKey(0)
    k1, k2, k3, k4, k5, k6 = jax.random.split(key, 6)

    # Case 1: small GCN-sized problem (128 nodes, 32 classes), auto tile.
    N, C = 128, 32
    h = jax.random.normal(k1, (N, C), dtype=jnp.float32)
    labels = jax.random.randint(k2, (N,), 0, C, dtype=jnp.int32)  # 0 == padding_idx
    out = jax.block_until_ready(gcn_uturn_apex(h, labels))
    ref = gcn_uturn_apex_ref(h, labels)
    assert jnp.allclose(out, ref, rtol=1e-5, atol=1e-4), (out, ref)

    # Case 2: multi-block grid + tail-column mask (N not divisible by tile).
    N2, C2 = 200, 32
    h2 = jax.random.normal(k3, (N2, C2), dtype=jnp.float32)
    labels2 = jax.random.randint(k4, (N2,), 0, C2, dtype=jnp.int32)
    out2 = jax.block_until_ready(gcn_uturn_apex(h2, labels2, tn=128))
    ref2 = gcn_uturn_apex_ref(h2, labels2)
    assert jnp.allclose(out2, ref2, rtol=1e-5, atol=1e-4), (out2, ref2)

    # Case 3: class count not a multiple of 8 (full-extent sublane block),
    # multi-block with tail mask.
    N3, C3 = 300, 40
    h3 = jax.random.normal(k5, (N3, C3), dtype=jnp.float32)
    labels3 = jax.random.randint(k6, (N3,), 0, C3, dtype=jnp.int32)
    out3 = jax.block_until_ready(gcn_uturn_apex(h3, labels3, tn=128))
    ref3 = gcn_uturn_apex_ref(h3, labels3)
    assert jnp.allclose(out3, ref3, rtol=1e-5, atol=1e-4), (out3, ref3)

    print("KERNEL_OK")
</pallas_src>

<mosaic_0001>
module attributes {stable_mosaic.version = 11 : i64} {
  func.func @_xent_kernel(%arg0: i32, %arg1: memref<32x128xf32, #tpu.memory_space<vmem>>, %arg2: memref<1x128xi32, #tpu.memory_space<vmem>>, %arg3: memref<1x128xf32, #tpu.memory_space<vmem>>) attributes {dimension_semantics = [#tpu.dimension_semantics<parallel>], iteration_bounds = array<i64: 1>, scalar_prefetch = 0 : i64, scratch_operands = 0 : i64, tpu.core_type = #tpu.core_type<tc>, window_params = [{transform_indices = @transform_0, window_bounds = array<i64: 32, 128>}, {transform_indices = @transform_1, window_bounds = array<i64: 1, 128>}, {transform_indices = @transform_2, window_bounds = array<i64: 1, 128>}]} {
    %c0 = arith.constant 0 : index
    %c0_0 = arith.constant 0 : index
    %0 = vector.load %arg1[%c0, %c0_0] : memref<32x128xf32, #tpu.memory_space<vmem>>, vector<32x128xf32>
    %c0_1 = arith.constant 0 : index
    %c0_2 = arith.constant 0 : index
    %1 = vector.load %arg2[%c0_1, %c0_2] : memref<1x128xi32, #tpu.memory_space<vmem>>, vector<1x128xi32>
    %cst = arith.constant dense<0xFF800000> : vector<128xf32>
    %2 = vector.multi_reduction <maximumf>, %0, %cst [0] : vector<32x128xf32> to vector<128xf32>
    %3 = vector.shape_cast %2 : vector<128xf32> to vector<1x128xf32>
    %4 = vector.broadcast %3 : vector<1x128xf32> to vector<32x128xf32>
    %5 = arith.subf %0, %4 : vector<32x128xf32>
    %6 = math.exp %5 : vector<32x128xf32>
    %cst_3 = arith.constant dense<0.000000e+00> : vector<128xf32>
    %7 = vector.multi_reduction <add>, %6, %cst_3 [0] : vector<32x128xf32> to vector<128xf32>
    %8 = vector.shape_cast %7 : vector<128xf32> to vector<1x128xf32>
    %9 = math.log %8 : vector<1x128xf32>
    %10 = arith.addf %9, %3 : vector<1x128xf32>
    %11 = tpu.iota {dimensions = array<i32: 0>} : vector<32x128xi32>
    %12 = vector.broadcast %1 : vector<1x128xi32> to vector<32x128xi32>
    %13 = arith.cmpi eq, %11, %12 : vector<32x128xi32>
    %cst_4 = arith.constant 0.000000e+00 : f32
    %14 = vector.broadcast %cst_4 : f32 to vector<32x128xf32>
    %15 = arith.select %13, %0, %14 : vector<32x128xi1>, vector<32x128xf32>
    %cst_5 = arith.constant dense<0.000000e+00> : vector<128xf32>
    %16 = vector.multi_reduction <add>, %15, %cst_5 [0] : vector<32x128xf32> to vector<128xf32>
    %17 = vector.shape_cast %16 : vector<128xf32> to vector<1x128xf32>
    %18 = arith.subf %10, %17 : vector<1x128xf32>
    %c0_i32 = arith.constant 0 : i32
    %19 = vector.broadcast %c0_i32 : i32 to vector<1x128xi32>
    %20 = arith.cmpi ne, %1, %19 : vector<1x128xi32>
    %cst_6 = arith.constant 0.000000e+00 : f32
    %21 = vector.broadcast %cst_6 : f32 to vector<1x128xf32>
    %22 = arith.select %20, %18, %21 : vector<1x128xi1>, vector<1x128xf32>
    %c0_7 = arith.constant 0 : index
    %c0_8 = arith.constant 0 : index
    %23 = vector.load %arg3[%c0_7, %c0_8] : memref<1x128xf32, #tpu.memory_space<vmem>>, vector<1x128xf32>
    tpu.vector_store %arg3[%c0_7, %c0_8], %22 {strides = array<i32>} : memref<1x128xf32, #tpu.memory_space<vmem>>, vector<1x128xf32>,
    return
  }
  func.func @transform_0(%arg0: i32) -> (i32, i32) {
    %c0_i32 = arith.constant 0 : i32
    %c0_i32_0 = arith.constant 0 : i32
    return %c0_i32, %arg0 : i32, i32
  }
  func.func @transform_1(%arg0: i32) -> (i32, i32) {
    %c0_i32 = arith.constant 0 : i32
    %c0_i32_0 = arith.constant 0 : i32
    return %c0_i32, %arg0 : i32, i32
  }
  func.func @transform_2(%arg0: i32) -> (i32, i32) {
    %c0_i32 = arith.constant 0 : i32
    %c0_i32_0 = arith.constant 0 : i32
    return %c0_i32, %arg0 : i32, i32
  }
}

</mosaic_0001>

<bundles_post_ra>
// kernel: tpu_custom_call.1
= control target key start
LH: loop header
LB: loop body
LE: loop exit
PB: predicated region body
PF: predicated region fallthrough
CT: control target
= control target key end

     0   :  { %7 = vsyncpa [#allocation3], 0  ;;  %s217_s0 = inlined_call_operand.hbm [shape: f32[32,128], index: 0, kind: input, shape index: {}]   ;;  %s218_s1 = inlined_call_operand.vmem [shape: s32[1,128], index: 1, kind: input, shape index: {}]   ;;  %s219_s2 = inlined_call_operand.hbm [shape: f32[1,128], index: 2, kind: output, shape index: {}]  }
   0x1   :  { %8 = vsyncpa [#allocation4], 0  ;;  %s171_s9 = smov [#allocation2]   ;;  %s123_s13 = scalar_lea.hbm %s217_s0, 512 }
   0x2   :  { %s14_s10 = sshll.u32 %s171_s9, 4  ;;  %p124_p0 = scmp.ne.s32.totalorder %s217_s0, %s123_s13  ;;  %s15_s10 = int_to_ptr.vmem [resolvable:$true] %s14_s10 }
   0x3   :  { %p127_p1 = scmp.lt.u32.totalorder %s123_s13, %s217_s0 }
   0x5   :  { %p129_p2 = pnand %p127_p1, %p124_p0 }
   0x7   :  { %132 = shalt.err (!%p129_p2)
}
   0x8   :  { %s133_s18 = scalar_lea.vmem %s15_s10, 512  ;;  %p138_p4 = scmp.lt.s32.totalorder %s15_s10, %s15_s10 }
   0x9   :  { %p134_p3 = scmp.ne.s32.totalorder %s15_s10, %s133_s18  ;;  %p139_p5 = scmp.lt.s32.totalorder %s133_s18, %s133_s18 }
   0xb   :  { %p140_p6 = por %p139_p5, %p138_p4 }
   0xd   :  { %p141_p7 = pnand %p140_p6, %p134_p3 }
   0xf   :  { %144 = shalt.err (!%p141_p7)
}
  0x10   :  { %s172_s19 = smov 128   ;;  %s173_s20 = smov 8  }
  0x11   :  { %20 = dma.hbm_to_vmem [thread:$0]  %s217_s0, 512, %s15_s10, [#allocation3], %s172_s19, %s172_s19, %s173_s20  }
  0x12   :  { %167 = dma.done.wait [#allocation3], 512  }
  0x13   :  { %168 = vsyncadd [#allocation3], 4294966784  ;;  %v26_v0 = vld [vmem:[#allocation2] sm:$0xff]  ;;  %v27_v1 = vld [vmem:[#allocation2 + $0x8] sm:$0xff]  ;;  %v64_v9 = vlaneseq }
  0x14   :  { %v28_v2 = vld [vmem:[#allocation2 + $0x10] sm:$0xff]  ;;  %v29_v3 = vld [vmem:[#allocation2 + $0x18] sm:$0xff]  ;;  %v31_v4 = vmax.f32 %v26_v0, %v27_v1  ;;  %v30_v16 = vld [vmem:[%s218_s1] sm:$0x1]  ;;  %s174_s1 = smov [#allocation5]  }
  0x15   :  { %v32_v5 = vmax.f32 %v28_v2, %v29_v3  ;;  %v65_v12 = vshrl.u32 %v64_v9, 7  ;;  %s100_s24 = sshll.u32 %s174_s1, 4  ;;  %vm91_vm4 = vcmp.ne.s32.totalorder %v30_v16, 0  ;;  %s101_s24 = int_to_ptr.vmem [resolvable:$true] %s100_s24 }
  0x16   :  { %s145_s25 = scalar_lea.vmem %s101_s24, 16  ;;  %s149_s26 = scalar_lea.vmem %s101_s24, 32 }
  0x17   :  { %v33_v6 = vmax.f32 %v31_v4, %v32_v5  ;;  %v71_v15 = vsub.s32 0, %v65_v12  ;;  %v66_v25 = vadd.s32 8, %v65_v12  ;;  %v67_v27 = vadd.s32 16, %v65_v12  ;;  %p146_p8 = scmp.ne.s32.totalorder %s101_s24, %s145_s25  ;;  %p150_p9 = scmp.lt.s32.totalorder %s101_s24, %s101_s24 }
  0x18   :  { %v68_v30 = vadd.s32 24, %v65_v12  ;;  %p151_p10 = scmp.lt.s32.totalorder %s149_s26, %s145_s25 }
  0x19   :  { %v34_v7 = vrot.slane %v33_v6, 4  ;;  %v72_v26 = vrot.slane %v30_v16, %v71_v15 }
  0x1a   :  { %p152_p11 = por %p151_p10, %p150_p9 }
  0x1b   :  { %v35_v8 = vmax.f32 %v33_v6, %v34_v7  ;;  %vm73_vm0 = vcmp.eq.s32.totalorder %v65_v12, %v72_v26  ;;  %vm74_vm1 = vcmp.eq.s32.totalorder %v66_v25, %v72_v26  ;;  %vm75_vm2 = vcmp.eq.s32.totalorder %v67_v27, %v72_v26 }
  0x1c   :  { %v77_v28 = vsel %vm73_vm0, %v26_v0, 0.0  ;;  %v78_v29 = vsel %vm74_vm1, %v27_v1, 0.0  ;;  %v79_v33 = vsel %vm75_vm2, %v28_v2, 0.0  ;;  %vm76_vm3 = vcmp.eq.s32.totalorder %v68_v30, %v72_v26  ;;  %p153_p12 = pnand %p152_p11, %p146_p8 }
  0x1d   :  { %v36_v10 = vrot.slane %v35_v8, 2  ;;  %v81_v31 = vadd.f32 %v78_v29, %v77_v28  ;;  %v80_v40 = vsel %vm76_vm3, %v29_v3, 0.0 }
  0x1f   :  { %v37_v11 = vmax.f32 %v35_v8, %v36_v10  ;;  %v82_v38 = vadd.f32 %v81_v31, %v79_v33 }
  0x21   :  { %v38_v13 = vrot.slane %v37_v11, 1  ;;  %v83_v42 = vadd.f32 %v82_v38, %v80_v40 }
  0x23   :  { %v39_v14 = vmax.f32 %v37_v11, %v38_v13  ;;  %v84_v45 = vrot.slane %v83_v42, 4 }
  0x25   :  { %v40_v17 = vsub.f32 %v26_v0, %v39_v14  ;;  %v41_v18 = vsub.f32 %v27_v1, %v39_v14  ;;  %v42_v19 = vsub.f32 %v28_v2, %v39_v14  ;;  %v43_v20 = vsub.f32 %v29_v3, %v39_v14 }
  0x26   :  { %v85_v48 = vadd.f32 %v84_v45, %v83_v42 }
  0x27   :  { %v44_v21 = vmul.f32 1.442695, %v40_v17  ;;  %v46_v22 = vmul.f32 1.442695, %v41_v18  ;;  %v48_v23 = vmul.f32 1.442695, %v42_v19 }
  0x28   :  { %v50_v24 = vmul.f32 1.442695, %v43_v20  ;;  %v86_v51 = vrot.slane %v85_v48, 2 }
  0x29   :  { %113 = vpow2.f32 %v44_v21 }
  0x2a   :  { %115 = vpow2.f32 %v46_v22  ;;  %v87_v52 = vadd.f32 %v86_v51, %v85_v48 }
  0x2b   :  { %117 = vpow2.f32 %v48_v23 }
  0x2c   :  { %119 = vpow2.f32 %v50_v24  ;;  %v88_v53 = vrot.slane %v87_v52, 1 }
  0x2e   :  { %v89_v56 = vadd.f32 %v88_v53, %v87_v52 }
  0x33   :  { %v114_v32 = vpop.eup %113 }
  0x34   :  { %v116_v34 = vpop.eup %115 }
  0x35   :  { %v118_v35 = vpop.eup %117  ;;  %v52_v36 = vadd.f32 %v116_v34, %v114_v32 }
  0x36   :  { %v120_v37 = vpop.eup %119 }
  0x37   :  { %v53_v39 = vadd.f32 %v118_v35, %v52_v36 }
  0x39   :  { %v54_v41 = vadd.f32 %v120_v37, %v53_v39 }
  0x3b   :  { %v55_v43 = vrot.slane %v54_v41, 4 }
  0x3d   :  { %v56_v44 = vadd.f32 %v55_v43, %v54_v41 }
  0x3f   :  { %v57_v46 = vrot.slane %v56_v44, 2 }
  0x41   :  { %v58_v47 = vadd.f32 %v57_v46, %v56_v44 }
  0x43   :  { %v59_v49 = vrot.slane %v58_v47, 1 }
  0x45   :  { %v60_v50 = vadd.f32 %v59_v49, %v58_v47 }
  0x47   :  { %121 = vlog2.f32 %v60_v50 }
  0x51   :  { %v122_v54 = vpop.eup %121 }
  0x52   :  { %v62_v55 = vmul.f32 0.6931472, %v122_v54 }
  0x54   :  { %v63_v57 = vadd.f32 %v62_v55, %v39_v14 }
  0x56   :  { %v90_v58 = vsub.f32 %v63_v57, %v89_v56 }
  0x58   :  { %v92_v59 = vsel %vm91_vm4, %v90_v58, 0.0 }
  0x59   :  { %93 = vst [vmem:[#allocation5] sm:$0x1] %v92_v59 }
  0x5a   :  { %156 = shalt.err (!%p153_p12)
}
  0x5b   :  { %s157_s29 = scalar_lea.hbm %s219_s2, 16 }
  0x5c   :  { %p158_p13 = scmp.ne.s32.totalorder %s219_s2, %s157_s29  ;;  %p161_p0 = scmp.lt.u32.totalorder %s157_s29, %s219_s2 }
  0x5e   :  { %p163_p1 = pnand %p161_p0, %p158_p13 }
  0x60   :  { %166 = shalt.err (!%p163_p1)
}
  0x61   :  { %103 = dma.vmem_to_hbm [thread:$0]  %s101_s24, 16, %s219_s2, [#allocation4]  }
  0x62   :  { %169 = dma.done.wait [#allocation4], 16  }
  0x63   :  { %170 = vsyncadd [#allocation4], 4294967280 }
  0x64   :  { %107 = vsyncpa [#allocation3], 1 }
  0x65   :  { %108 = vsyncpa [#allocation4], 1 }

</bundles_post_ra>
